<compile_context>
chip_gen: v6e
topology: v6e:2x2x1
jax: 0.10.0
libtpu: 0.0.40
codegen_flags: <defaults>
</compile_context>

<pallas_src>
import jax
import jax.numpy as jnp
from jax.experimental import pallas as pl
from jax.experimental.pallas import tpu as pltpu  # noqa: F401  (kept for TPU-only variants)

M = K = N = 64  # shapes implied by torch.rand(64, 64) @ torch.rand(64, 64)


def addmm_kernel(x_ref, a_ref, b_ref, o_ref):
    # MXU matmul with f32 accumulation + VPU bias add; single full-tile store.
    acc = jnp.dot(a_ref[...], b_ref[...], preferred_element_type=jnp.float32)
    o_ref[...] = x_ref[...] + acc


def addmm_pallas(x1, a, b):
    return pl.pallas_call(
        addmm_kernel,
        out_shape=jax.ShapeDtypeStruct((M, N), jnp.float32),
        in_specs=[
            pl.BlockSpec((M, N), lambda: (0, 0)),  # bias x1
            pl.BlockSpec((M, K), lambda: (0, 0)),  # a
            pl.BlockSpec((K, N), lambda: (0, 0)),  # b
        ],
        out_specs=pl.BlockSpec((M, N), lambda: (0, 0)),
        # Alias the bias buffer into the output (addmm == in-place x += a@b).
        input_output_aliases={0: 0},
    )(x1, a, b)


@jax.jit
def model_forward(x1, a, b):
    """Mirrors Model.forward: v1 = addmm(x1, rand(64,64), rand(64,64)); [v1]."""
    v1 = addmm_pallas(x1, a, b)
    return [v1]


if __name__ == "__main__":
    key = jax.random.PRNGKey(0)
    kx, ka, kb = jax.random.split(key, 3)
    x1 = jax.random.normal(kx, (M, N), dtype=jnp.float32)        # ~ torch.randn
    a = jax.random.uniform(ka, (M, K), dtype=jnp.float32)        # ~ torch.rand
    b = jax.random.uniform(kb, (K, N), dtype=jnp.float32)        # ~ torch.rand

    out = model_forward(x1, a, b)
    v1 = jax.block_until_ready(out[0])
    assert v1.shape == (M, N) and v1.dtype == jnp.float32

    ref = x1 + a @ b
    assert jnp.allclose(v1, ref, atol=1e-4, rtol=1e-4)

    print("KERNEL_OK")
</pallas_src>

<mosaic_0001>
module attributes {stable_mosaic.version = 11 : i64} {
  func.func @addmm_kernel(%arg0: memref<64x64xf32, #tpu.memory_space<vmem>>, %arg1: memref<64x64xf32, #tpu.memory_space<vmem>>, %arg2: memref<64x64xf32, #tpu.memory_space<vmem>>, %arg3: memref<64x64xf32, #tpu.memory_space<vmem>>) attributes {dimension_semantics = [], scalar_prefetch = 0 : i64, scratch_operands = 0 : i64, tpu.core_type = #tpu.core_type<tc>} {
    %c0 = arith.constant 0 : index
    %c0_0 = arith.constant 0 : index
    %0 = vector.load %arg1[%c0, %c0_0] : memref<64x64xf32, #tpu.memory_space<vmem>>, vector<64x64xf32>
    %c0_1 = arith.constant 0 : index
    %c0_2 = arith.constant 0 : index
    %1 = vector.load %arg2[%c0_1, %c0_2] : memref<64x64xf32, #tpu.memory_space<vmem>>, vector<64x64xf32>
    %cst = arith.constant dense<0.000000e+00> : vector<64x64xf32>
    %2 = tpu.matmul %0, %1, %cst {dimension_numbers = #tpu.dot_dimension_numbers<[1], [0], [0], [1], [0, 0, 1, 1], [], []>} : vector<64x64xf32>, vector<64x64xf32>, vector<64x64xf32> -> vector<64x64xf32>
    %c0_3 = arith.constant 0 : index
    %c0_4 = arith.constant 0 : index
    %3 = vector.load %arg0[%c0_3, %c0_4] : memref<64x64xf32, #tpu.memory_space<vmem>>, vector<64x64xf32>
    %4 = arith.addf %3, %2 : vector<64x64xf32>
    %c0_5 = arith.constant 0 : index
    %c0_6 = arith.constant 0 : index
    %5 = vector.load %arg3[%c0_5, %c0_6] : memref<64x64xf32, #tpu.memory_space<vmem>>, vector<64x64xf32>
    tpu.vector_store %arg3[%c0_5, %c0_6], %4 {strides = array<i32>} : memref<64x64xf32, #tpu.memory_space<vmem>>, vector<64x64xf32>,
    return
  }
}

</mosaic_0001>

<bundles_post_ra>
// kernel: model_forward.1
= control target key start
LH: loop header
LB: loop body
LE: loop exit
PB: predicated region body
PF: predicated region fallthrough
CT: control target
= control target key end

     0   :  { %8 = vsyncpa [#allocation3], 0  ;;  %s432_s0 = inlined_call_operand.hbm [shape: f32[64,64], index: 0, kind: input, shape index: {}, may-alias: {0,3}]   ;;  %s433_s1 = inlined_call_operand.vmem [shape: f32[64,64], index: 1, kind: input, shape index: {}]   ;;  %s434_s2 = inlined_call_operand.vmem [shape: f32[64,64], index: 2, kind: input, shape index: {}]   ;;  %s435_s3 = inlined_call_operand.hbm [shape: f32[64,64], index: 3, kind: output, shape index: {}, may-alias: {0,3}]  }
   0x1   :  { %9 = vsyncpa [#allocation4], 0  ;;  %s332_s12 = smov [#allocation2]  }
   0x2   :  { %s15_s13 = sshll.u32 %s332_s12, 4  ;;  %s16_s13 = int_to_ptr.vmem [resolvable:$true] %s15_s13 }
   0x3   :  { %s296_s14 = scalar_lea.vmem %s16_s13, 1024  ;;  %p301_p1 = scmp.lt.s32.totalorder %s16_s13, %s16_s13 }
   0x4   :  { %p297_p0 = scmp.ne.s32.totalorder %s16_s13, %s296_s14  ;;  %p302_p2 = scmp.lt.s32.totalorder %s296_s14, %s296_s14 }
   0x6   :  { %p303_p3 = por %p302_p2, %p301_p1 }
   0x8   :  { %p304_p4 = pnand %p303_p3, %p297_p0 }
   0xa   :  { %307 = shalt.err (!%p304_p4)
}
   0xb   :  { %s333_s15 = smov 128   ;;  %s334_s16 = smov 8  }
   0xc   :  { %21 = dma.hbm_to_vmem [thread:$0]  %s432_s0, 1024, %s16_s13, [#allocation3], %s333_s15, %s333_s15, %s334_s16  }
   0xd   :  { %328 = dma.done.wait [#allocation3], 1024  }
   0xe   :  { %329 = vsyncadd [#allocation3], 4294966272  ;;  %v44_v0 = vld [vmem:[%s434_s2 + $0x38] sm:$0xff]  ;;  %v43_v1 = vld [vmem:[%s434_s2 + $0x30] sm:$0xff]  ;;  %vm45_vm0 = vcmask 523264  }
   0xf   :  { %240 = vmatprep.subr.mxu0 %v44_v0  ;;  %268 = vmatprep.subr.mxu1 %v44_v0  ;;  %v42_v2 = vld [vmem:[%s434_s2 + $0x28] sm:$0xff]  ;;  %v41_v3 = vld [vmem:[%s434_s2 + $0x20] sm:$0xff]  ;;  %v40_v4 = vld [vmem:[%s434_s2 + $0x18] sm:$0xff] }
  0x10   :  { %241 = vmatpush3.msra.mxu0 %v44_v0  ;;  %276 = vmatpush3.msra.mxu1 %v44_v0  ;;  %v39_v5 = vld [vmem:[%s434_s2 + $0x10] sm:$0xff]  ;;  %v38_v6 = vld [vmem:[%s434_s2 + $0x8] sm:$0xff]  ;;  %v37_v7 = vld [vmem:[%s434_s2] sm:$0xff] }
  0x11   :  { %242 = vmatprep.subr.mxu0 %v43_v1  ;;  %269 = vmatprep.subr.mxu1 %v43_v1  ;;  %v29_v8 = vld [vmem:[%s433_s1] sm:$0xff]  ;;  %v30_v10 = vld [vmem:[%s433_s1 + $0x8] sm:$0xff]  ;;  %v31_v12 = vld [vmem:[%s433_s1 + $0x10] sm:$0xff] }
  0x12   :  { %243 = vmatpush3.msra.mxu0 %v43_v1  ;;  %277 = vmatpush3.msra.mxu1 %v43_v1  ;;  %v33_v9 = vld [vmem:[%s433_s1 + $0x20] sm:$0xff]  ;;  %v34_v11 = vld [vmem:[%s433_s1 + $0x28] sm:$0xff]  ;;  %v35_v13 = vld [vmem:[%s433_s1 + $0x30] sm:$0xff] }
  0x13   :  { %244 = vmatprep.subr.mxu0 %v42_v2  ;;  %270 = vmatprep.subr.mxu1 %v42_v2  ;;  %v32_v14 = vld [vmem:[%s433_s1 + $0x18] sm:$0xff]  ;;  %v176_v16 = vld [vmem:[#allocation2 + $0x8] sm:$0xff]  ;;  %v175_v20 = vld [vmem:[#allocation2] sm:$0xff] }
  0x14   :  { %245 = vmatpush3.msra.mxu0 %v42_v2  ;;  %278 = vmatpush3.msra.mxu1 %v42_v2  ;;  %v36_v15 = vld [vmem:[%s433_s1 + $0x38] sm:$0xff]  ;;  %v180_v17 = vld [vmem:[#allocation2 + $0x28] sm:$0xff]  ;;  %v179_v21 = vld [vmem:[#allocation2 + $0x20] sm:$0xff]  ;;  %s335_s1 = smov [#allocation5]  }
  0x15   :  { %246 = vmatprep.subr.mxu0 %v41_v3  ;;  %271 = vmatprep.subr.mxu1 %v41_v3  ;;  %v178_v26 = vld [vmem:[#allocation2 + $0x18] sm:$0xff]  ;;  %v177_v32 = vld [vmem:[#allocation2 + $0x10] sm:$0xff]  ;;  %s204_s24 = sshll.u32 %s335_s1, 4  ;;  %s205_s24 = int_to_ptr.vmem [resolvable:$true] %s204_s24 }
  0x16   :  { %247 = vmatpush3.msra.mxu0 %v41_v3  ;;  %279 = vmatpush3.msra.mxu1 %v41_v3  ;;  %v182_v27 = vld [vmem:[#allocation2 + $0x38] sm:$0xff]  ;;  %v181_v33 = vld [vmem:[#allocation2 + $0x30] sm:$0xff]  ;;  %s308_s0 = scalar_lea.vmem %s205_s24, 1024  ;;  %p313_p6 = scmp.lt.s32.totalorder %s205_s24, %s205_s24 }
  0x17   :  { %248 = vmatprep.subr.mxu0 %v40_v4  ;;  %272 = vmatprep.subr.mxu1 %v40_v4  ;;  %p309_p5 = scmp.ne.s32.totalorder %s205_s24, %s308_s0  ;;  %p314_p7 = scmp.lt.s32.totalorder %s308_s0, %s308_s0 }
  0x18   :  { %249 = vmatpush3.msra.mxu0 %v40_v4  ;;  %280 = vmatpush3.msra.mxu1 %v40_v4 }
  0x19   :  { %250 = vmatprep.subr.mxu0 %v39_v5  ;;  %273 = vmatprep.subr.mxu1 %v39_v5  ;;  %p315_p8 = por %p314_p7, %p313_p6 }
  0x1a   :  { %251 = vmatpush3.msra.mxu0 %v39_v5  ;;  %281 = vmatpush3.msra.mxu1 %v39_v5 }
  0x1b   :  { %252 = vmatprep.subr.mxu0 %v38_v6  ;;  %274 = vmatprep.subr.mxu1 %v38_v6  ;;  %p316_p9 = pnand %p315_p8, %p309_p5 }
  0x1c   :  { %253 = vmatpush3.msra.mxu0 %v38_v6  ;;  %282 = vmatpush3.msra.mxu1 %v38_v6 }
  0x1d   :  { %254 = vmatprep.subr.mxu0 %v37_v7  ;;  %275 = vmatprep.subr.mxu1 %v37_v7 }
  0x1e   :  { %255 = vmatpush3.msra.mxu0 %v37_v7  ;;  %283 = vmatpush3.msra.mxu1 %v37_v7 }
  0x1f   :  { %256 = vmatprep.mubr.msk.f32.mxu0 %vm45_vm0, %v29_v8  ;;  %262 = vmatprep.mubr.msk.f32.mxu1 %vm45_vm0, %v33_v9 }
  0x20   :  { %257 = vmatmul.mubr.msk.f32.vlgmr.msra.gmra.mxu0 %vm45_vm0, %v30_v10  ;;  %263 = vmatmul.mubr.msk.f32.vlgmr.msra.gmra.mxu1 %vm45_vm0, %v34_v11 }
  0x21   :  { %259 = vmatprep.mubr.msk.f32.mxu0 %vm45_vm0, %v31_v12  ;;  %265 = vmatprep.mubr.msk.f32.mxu1 %vm45_vm0, %v35_v13 }
  0x24   :  { %260 = vmatmul.mubr.msk.f32.gmra.mxu0 %vm45_vm0, %v32_v14  ;;  %266 = vmatmul.mubr.msk.f32.gmra.mxu1 %vm45_vm0, %v36_v15 }
  0xe0   :  { %v258_v18 = vpop.f32.mrf.mxu0  ;;  %v264_v19 = vpop.f32.mrf.mxu1 }
  0xe1   :  { %v184_v22 = vadd.f32 %v258_v18, %v176_v16  ;;  %v188_v23 = vadd.f32 %v264_v19, %v180_v17 }
  0xe2   :  { %v136_v24 = vpop.f32.mrf.mxu0  ;;  %v156_v25 = vpop.f32.mrf.mxu1 }
  0xe3   :  { %192 = vst.msk [vmem:[#allocation5 + $0x8] sm:$0xff] %vm45_vm0, %v184_v22  ;;  %196 = vst.msk [vmem:[#allocation5 + $0x28] sm:$0xff] %vm45_vm0, %v188_v23  ;;  %v183_v28 = vadd.f32 %v175_v20, %v136_v24  ;;  %v187_v29 = vadd.f32 %v179_v21, %v156_v25 }
  0xe4   :  { %v261_v30 = vpop.f32.mrf.mxu0  ;;  %v267_v31 = vpop.f32.mrf.mxu1 }
  0xe5   :  { %191 = vst.msk [vmem:[#allocation5] sm:$0xff] %vm45_vm0, %v183_v28  ;;  %195 = vst.msk [vmem:[#allocation5 + $0x20] sm:$0xff] %vm45_vm0, %v187_v29  ;;  %v186_v34 = vadd.f32 %v261_v30, %v178_v26  ;;  %v190_v35 = vadd.f32 %v267_v31, %v182_v27 }
  0xe6   :  { %v146_v36 = vpop.f32.mrf.mxu0  ;;  %v166_v37 = vpop.f32.mrf.mxu1 }
  0xe7   :  { %194 = vst.msk [vmem:[#allocation5 + $0x18] sm:$0xff] %vm45_vm0, %v186_v34  ;;  %198 = vst.msk [vmem:[#allocation5 + $0x38] sm:$0xff] %vm45_vm0, %v190_v35  ;;  %v185_v38 = vadd.f32 %v177_v32, %v146_v36  ;;  %v189_v39 = vadd.f32 %v181_v33, %v166_v37 }
  0xe9   :  { %193 = vst.msk [vmem:[#allocation5 + $0x10] sm:$0xff] %vm45_vm0, %v185_v38  ;;  %197 = vst.msk [vmem:[#allocation5 + $0x30] sm:$0xff] %vm45_vm0, %v189_v39 }
  0xea   :  { %319 = shalt.err (!%p316_p9)
}
  0xeb   :  { %210 = dma.vmem_to_hbm [thread:$0]  %s205_s24, 1024, %s435_s3, [#allocation4], %s333_s15, %s333_s15, %s334_s16  }
  0xec   :  { %330 = dma.done.wait [#allocation4], 1024  }
  0xed   :  { %331 = vsyncadd [#allocation4], 4294966272 }
  0xee   :  { %214 = vsyncpa [#allocation3], 1 }
  0xef   :  { %215 = vsyncpa [#allocation4], 1 }

</bundles_post_ra>
